<compile_context>
chip_gen: v5e
topology: v5e:2x2
jax: 0.10.0
libtpu: 0.0.40
codegen_flags: <defaults>
</compile_context>

<pallas_src>
import jax
import jax.numpy as jnp
from jax import lax
from jax.experimental import pallas as pl
from jax.experimental.pallas import tpu as pltpu

EPS = 1e-5  # nn.BatchNorm2d default eps


def _round_up(x, m):
    return (x + m - 1) // m * m


# ---------------- phase 1: bias-free conv matmul + per-channel sum / sumsq ----------------
def conv_stats_kernel(w_ref, p_ref, sum_ref, ssq_ref):
    # w_ref: (Cout8, K)   p_ref: (K, tile_m)   sum_ref/ssq_ref: (Cout8, 1) per-split accumulators
    z = jnp.dot(w_ref[...], p_ref[...], preferred_element_type=jnp.float32)  # (Cout8, tile_m)

    @pl.when(pl.program_id(1) == 0)
    def _init():
        sum_ref[...] = jnp.zeros_like(sum_ref)
        ssq_ref[...] = jnp.zeros_like(ssq_ref)

    sum_ref[...] += jnp.sum(z, axis=1, keepdims=True)
    ssq_ref[...] += jnp.sum(z * z, axis=1, keepdims=True)


# ---------------- phase 2: recompute conv tile, fused scale/shift + ReLU ----------------
def conv_bn_relu_kernel(w_ref, p_ref, scale_ref, shift_ref, o_ref):
    # Recomputing the cheap K-contraction matmul avoids an f32 HBM round-trip of the conv
    # intermediate. scale/shift are (Cout8, 1) f32, broadcast along lanes.
    z = jnp.dot(w_ref[...], p_ref[...], preferred_element_type=jnp.float32)  # (Cout8, tile_m)
    o_ref[...] = jnp.maximum(z * scale_ref[...] + shift_ref[...], 0.0)


def conv_block_forward(x, weight, bias, gamma, beta, *, stride=2, padding=2,
                       tile_m=1024, compute_dtype=jnp.bfloat16):
    """x: (N, Cin, H, W) f32, weight: (Cout, Cin, KH, KW), bias/gamma/beta: (Cout,)."""
    N, Cin, H, W = x.shape
    Cout, _, KH, KW = weight.shape
    OH = (H + 2 * padding - KH) // stride + 1
    OW = (W + 2 * padding - KW) // stride + 1
    M = N * OH * OW
    K = Cin * KH * KW

    Cout8 = _round_up(Cout, 8)                   # sublane-aligned channel dim (NOT padded to 128)
    tile_m = _round_up(max(tile_m, 128), 128)    # lane-dense tiles (multiple of 128)
    tile_m = min(tile_m, _round_up(M, 128))
    n_tiles = pl.cdiv(M, tile_m)
    n_split = 2 if n_tiles >= 2 else 1           # per-core stat partials (v7x dual TC); 1 otherwise
    n_tiles = _round_up(n_tiles, n_split)
    tiles_per_split = n_tiles // n_split
    Mp = n_tiles * tile_m

    # ---- glue: transposed im2col  patT (K, Mp); rows ordered (cin, kh, kw) = PyTorch weight order,
    #      columns ordered (n, oh, ow). Zero-padded columns contribute 0 to the bias-free stats.
    # TODO(synk): move im2col into the kernel (pl.ANY input + KH*KW shifted matmuls over row bands).
    xp = jnp.pad(x, ((0, 0), (0, 0), (padding, padding), (padding, padding))).astype(compute_dtype)
    taps = [xp[:, :, kh:kh + stride * OH:stride, kw:kw + stride * OW:stride]
            for kh in range(KH) for kw in range(KW)]                 # each (N, Cin, OH, OW)
    pat = jnp.stack(taps, axis=2)                                    # (N, Cin, KH*KW, OH, OW)
    patT = pat.transpose(1, 2, 0, 3, 4).reshape(K, M)                # (K, M)
    patT = jnp.pad(patT, ((0, 0), (0, Mp - M)))

    w_mat = weight.reshape(Cout, K)
    w_mat = jnp.pad(w_mat, ((0, Cout8 - Cout), (0, 0))).astype(compute_dtype)   # (Cout8, K)

    itm = jnp.dtype(compute_dtype).itemsize
    flops = 2 * M * K * Cout
    vmem_limit = 32 * 1024 * 1024   # footprint is a few hundred KiB; safe on v5e/v6e/v7x

    # ---- phase 1: tiled bias-free matmul + per-split stats accumulation ----
    stats_sum, stats_ssq = pl.pallas_call(
        conv_stats_kernel,
        out_shape=(jax.ShapeDtypeStruct((n_split * Cout8, 1), jnp.float32),
                   jax.ShapeDtypeStruct((n_split * Cout8, 1), jnp.float32)),
        grid=(n_split, tiles_per_split),
        in_specs=[
            pl.BlockSpec((Cout8, K), lambda c, i: (0, 0)),                       # weights resident
            pl.BlockSpec((K, tile_m), lambda c, i: (0, c * tiles_per_split + i)),  # streamed patches
        ],
        out_specs=(
            pl.BlockSpec((Cout8, 1), lambda c, i: (c, 0)),   # per-split sum accumulator
            pl.BlockSpec((Cout8, 1), lambda c, i: (c, 0)),   # per-split sumsq accumulator
        ),
        compiler_params=pltpu.CompilerParams(
            dimension_semantics=("parallel", "arbitrary"),
            vmem_limit_bytes=vmem_limit),
        cost_estimate=pl.CostEstimate(
            flops=flops, transcendentals=0,
            bytes_accessed=K * Mp * itm + Cout8 * K * itm + 2 * n_split * Cout8 * 4),
    )(w_mat, patT)

    # ---- finalize BN stats (tiny per-channel math in the wrapper) ----
    csum = stats_sum.reshape(n_split, Cout8).sum(axis=0)
    cssq = stats_ssq.reshape(n_split, Cout8).sum(axis=0)
    bias8 = jnp.pad(bias.astype(jnp.float32), (0, Cout8 - Cout))
    gamma8 = jnp.pad(gamma.astype(jnp.float32), (0, Cout8 - Cout))
    beta8 = jnp.pad(beta.astype(jnp.float32), (0, Cout8 - Cout))
    mean_z = csum / M                                        # stats of the bias-free conv output
    var = jnp.maximum(cssq / M - mean_z * mean_z, 0.0)       # single-pass variance, clamped
    inv_std = lax.rsqrt(var + EPS)
    scale = gamma8 * inv_std
    mean_y = mean_z + bias8                                  # true BN batch mean of conv(x)+bias
    shift = beta8 + (bias8 - mean_y) * scale                 # bias cancels exactly under batch-BN
    scale_col = scale.reshape(Cout8, 1)
    shift_col = shift.reshape(Cout8, 1)

    # ---- phase 2: recompute conv tile, normalize + ReLU, channel-major lane-dense store ----
    out2d = pl.pallas_call(
        conv_bn_relu_kernel,
        out_shape=jax.ShapeDtypeStruct((Cout8, Mp), jnp.float32),
        grid=(n_tiles,),
        in_specs=[
            pl.BlockSpec((Cout8, K), lambda i: (0, 0)),      # weights resident
            pl.BlockSpec((K, tile_m), lambda i: (0, i)),     # streamed patches
            pl.BlockSpec((Cout8, 1), lambda i: (0, 0)),      # scale resident
            pl.BlockSpec((Cout8, 1), lambda i: (0, 0)),      # shift resident
        ],
        out_specs=pl.BlockSpec((Cout8, tile_m), lambda i: (0, i)),
        compiler_params=pltpu.CompilerParams(
            dimension_semantics=("parallel",),
            vmem_limit_bytes=vmem_limit),
        cost_estimate=pl.CostEstimate(
            flops=flops, transcendentals=0,
            bytes_accessed=K * Mp * itm + Cout8 * K * itm + Cout8 * Mp * 4 + 2 * Cout8 * 4),
    )(w_mat, patT, scale_col, shift_col)

    # channel-major (Cout, M) -> (N, Cout, OH, OW); slice away channel / M padding
    return out2d[:Cout, :M].reshape(Cout, N, OH, OW).transpose(1, 0, 2, 3)


if __name__ == "__main__":
    key = jax.random.PRNGKey(0)
    k_x, k_w, k_b = jax.random.split(key, 3)

    # Small shapes consistent with the module
    N, Cin, H, W = 2, 4, 16, 16
    Cout, ksz, stride, pad = 8, 3, 2, 2

    x = jax.random.normal(k_x, (N, Cin, H, W), dtype=jnp.float32)
    fan_in = Cin * ksz * ksz
    bound = 1.0 / (fan_in ** 0.5)
    weight = jax.random.uniform(k_w, (Cout, Cin, ksz, ksz), jnp.float32, -bound, bound)
    bias = jax.random.uniform(k_b, (Cout,), jnp.float32, -bound, bound)
    gamma = jnp.ones((Cout,), jnp.float32)
    beta = jnp.zeros((Cout,), jnp.float32)

    OH = (H + 2 * pad - ksz) // stride + 1
    OW = (W + 2 * pad - ksz) // stride + 1

    # Pure-JAX reference (Conv2d -> BN(training batch stats) -> ReLU), f32
    ref_conv = lax.conv_general_dilated(
        x, weight, (stride, stride), [(pad, pad), (pad, pad)],
        dimension_numbers=("NCHW", "OIHW", "NCHW"))
    ref_conv = ref_conv + bias[None, :, None, None]
    mu = ref_conv.mean(axis=(0, 2, 3), keepdims=True)
    var = ((ref_conv - mu) ** 2).mean(axis=(0, 2, 3), keepdims=True)
    ref = jnp.maximum(
        (ref_conv - mu) / jnp.sqrt(var + EPS) * gamma[None, :, None, None]
        + beta[None, :, None, None], 0.0)

    # 1) exact-semantics check: f32 matmul operands; tile_m=128 so the multi-tile,
    #    dual-split (per-core partial) stats path is exercised and reduced in the wrapper.
    out_f32 = conv_block_forward(x, weight, bias, gamma, beta, stride=stride, padding=pad,
                                 tile_m=128, compute_dtype=jnp.float32)
    out_f32 = jax.block_until_ready(out_f32)
    assert out_f32.shape == (N, Cout, OH, OW)
    assert jnp.allclose(out_f32, ref, atol=1e-4, rtol=1e-4), "f32 path mismatch vs reference"

    # 2) performance path: bf16 MXU operands (f32 accumulation + f32 BN math), default tiling;
    #    tolerance widened to bf16 input-quantization precision.
    out_bf16 = conv_block_forward(x, weight, bias, gamma, beta, stride=stride, padding=pad,
                                  compute_dtype=jnp.bfloat16)
    out_bf16 = jax.block_until_ready(out_bf16)
    assert out_bf16.shape == (N, Cout, OH, OW)
    assert jnp.allclose(out_bf16, ref, atol=5e-2, rtol=5e-2), "bf16 path mismatch vs reference"

    print("KERNEL_OK")
</pallas_src>

<mosaic_0001>
module attributes {stable_mosaic.version = 11 : i64} {
  func.func @conv_stats_kernel(%arg0: i32, %arg1: i32, %arg2: memref<8x36xf32, #tpu.memory_space<vmem>>, %arg3: memref<36x128xf32, #tpu.memory_space<vmem>>, %arg4: memref<8x1xf32, #tpu.memory_space<vmem>>, %arg5: memref<8x1xf32, #tpu.memory_space<vmem>>) attributes {dimension_semantics = [#tpu.dimension_semantics<parallel>, #tpu.dimension_semantics<arbitrary>], iteration_bounds = array<i64: 2, 1>, scalar_prefetch = 0 : i64, scratch_operands = 0 : i64, tpu.core_type = #tpu.core_type<tc>, window_params = [{pipeline_mode = #tpu.pipeline_mode<synchronous>, transform_indices = @transform_0, window_bounds = array<i64: 8, 36>}, {transform_indices = @transform_1, window_bounds = array<i64: 36, 128>}, {transform_indices = @transform_2, window_bounds = array<i64: 8, 1>}, {transform_indices = @transform_3, window_bounds = array<i64: 8, 1>}]} {
    %c0 = arith.constant 0 : index
    %c0_0 = arith.constant 0 : index
    %0 = vector.load %arg2[%c0, %c0_0] : memref<8x36xf32, #tpu.memory_space<vmem>>, vector<8x36xf32>
    %c0_1 = arith.constant 0 : index
    %c0_2 = arith.constant 0 : index
    %1 = vector.load %arg3[%c0_1, %c0_2] : memref<36x128xf32, #tpu.memory_space<vmem>>, vector<36x128xf32>
    %cst = arith.constant dense<0.000000e+00> : vector<8x128xf32>
    %2 = tpu.matmul %0, %1, %cst {dimension_numbers = #tpu.dot_dimension_numbers<[1], [0], [0], [1], [0, 0, 1, 1], [], []>} : vector<8x36xf32>, vector<36x128xf32>, vector<8x128xf32> -> vector<8x128xf32>
    %c0_i32 = arith.constant 0 : i32
    %3 = arith.cmpi eq, %arg1, %c0_i32 : i32
    %4 = arith.extui %3 : i1 to i32
    %c0_i32_3 = arith.constant 0 : i32
    %5 = arith.cmpi ne, %4, %c0_i32_3 : i32
    scf.if %5 {
      %cst_14 = arith.constant 0.000000e+00 : f32
      %17 = vector.broadcast %cst_14 : f32 to vector<8x1xf32>
      %c0_15 = arith.constant 0 : index
      %c0_16 = arith.constant 0 : index
      %18 = vector.load %arg4[%c0_15, %c0_16] : memref<8x1xf32, #tpu.memory_space<vmem>>, vector<8x1xf32>
      tpu.vector_store %arg4[%c0_15, %c0_16], %17 {strides = array<i32>} : memref<8x1xf32, #tpu.memory_space<vmem>>, vector<8x1xf32>,
      %cst_17 = arith.constant 0.000000e+00 : f32
      %19 = vector.broadcast %cst_17 : f32 to vector<8x1xf32>
      %c0_18 = arith.constant 0 : index
      %c0_19 = arith.constant 0 : index
      %20 = vector.load %arg5[%c0_18, %c0_19] : memref<8x1xf32, #tpu.memory_space<vmem>>, vector<8x1xf32>
      tpu.vector_store %arg5[%c0_18, %c0_19], %19 {strides = array<i32>} : memref<8x1xf32, #tpu.memory_space<vmem>>, vector<8x1xf32>,
    } else {
    }
    %c0_4 = arith.constant 0 : index
    %c0_5 = arith.constant 0 : index
    %6 = vector.load %arg4[%c0_4, %c0_5] : memref<8x1xf32, #tpu.memory_space<vmem>>, vector<8x1xf32>
    %cst_6 = arith.constant dense<0.000000e+00> : vector<8xf32>
    %7 = vector.multi_reduction <add>, %2, %cst_6 [1] : vector<8x128xf32> to vector<8xf32>
    %8 = vector.shape_cast %7 : vector<8xf32> to vector<8x1xf32>
    %9 = arith.addf %6, %8 : vector<8x1xf32>
    %c0_7 = arith.constant 0 : index
    %c0_8 = arith.constant 0 : index
    %10 = vector.load %arg4[%c0_7, %c0_8] : memref<8x1xf32, #tpu.memory_space<vmem>>, vector<8x1xf32>
    tpu.vector_store %arg4[%c0_7, %c0_8], %9 {strides = array<i32>} : memref<8x1xf32, #tpu.memory_space<vmem>>, vector<8x1xf32>,
    %c0_9 = arith.constant 0 : index
    %c0_10 = arith.constant 0 : index
    %11 = vector.load %arg5[%c0_9, %c0_10] : memref<8x1xf32, #tpu.memory_space<vmem>>, vector<8x1xf32>
    %12 = arith.mulf %2, %2 : vector<8x128xf32>
    %cst_11 = arith.constant dense<0.000000e+00> : vector<8xf32>
    %13 = vector.multi_reduction <add>, %12, %cst_11 [1] : vector<8x128xf32> to vector<8xf32>
    %14 = vector.shape_cast %13 : vector<8xf32> to vector<8x1xf32>
    %15 = arith.addf %11, %14 : vector<8x1xf32>
    %c0_12 = arith.constant 0 : index
    %c0_13 = arith.constant 0 : index
    %16 = vector.load %arg5[%c0_12, %c0_13] : memref<8x1xf32, #tpu.memory_space<vmem>>, vector<8x1xf32>
    tpu.vector_store %arg5[%c0_12, %c0_13], %15 {strides = array<i32>} : memref<8x1xf32, #tpu.memory_space<vmem>>, vector<8x1xf32>,
    return
  }
  func.func @transform_0(%arg0: i32, %arg1: i32) -> (i32, i32) {
    %c0_i32 = arith.constant 0 : i32
    %c0_i32_0 = arith.constant 0 : i32
    %c0_i32_1 = arith.constant 0 : i32
    return %c0_i32, %c0_i32_0 : i32, i32
  }
  func.func @transform_1(%arg0: i32, %arg1: i32) -> (i32, i32) {
    %c1_i32 = arith.constant 1 : i32
    %0 = arith.muli %arg0, %c1_i32 : i32
    %1 = arith.addi %0, %arg1 : i32
    %c0_i32 = arith.constant 0 : i32
    %c0_i32_0 = arith.constant 0 : i32
    return %c0_i32, %1 : i32, i32
  }
  func.func @transform_2(%arg0: i32, %arg1: i32) -> (i32, i32) {
    %c0_i32 = arith.constant 0 : i32
    %c0_i32_0 = arith.constant 0 : i32
    return %arg0, %c0_i32 : i32, i32
  }
  func.func @transform_3(%arg0: i32, %arg1: i32) -> (i32, i32) {
    %c0_i32 = arith.constant 0 : i32
    %c0_i32_0 = arith.constant 0 : i32
    return %arg0, %c0_i32 : i32, i32
  }
}

</mosaic_0001>

<bundles_post_ra>
// kernel: tpu_custom_call.1
= control target key start
LH: loop header
LB: loop body
LE: loop exit
PB: predicated region body
PF: predicated region fallthrough
CT: control target
= control target key end

     0   :  { %9 = vsyncpa [#allocation3], 0  ;;  %s755_s0 = inlined_call_operand.hbm [shape: f32[8,36], index: 0, kind: input, shape index: {}]   ;;  %s756_s1 = inlined_call_operand.hbm [shape: f32[36,256], index: 1, kind: input, shape index: {}]   ;;  %s757_s2 = inlined_call_operand.vmem [shape: f32[16,1], index: 2, kind: output, shape index: {0}]   ;;  %s758_s3 = inlined_call_operand.vmem [shape: f32[16,1], index: 3, kind: output, shape index: {1}]  }
   0x1   :  { %10 = vsyncpa [#allocation5], 0 }
   0x2   :  { %12 = vsyncpa [#allocation5 + $0x1], 0  ;;  %s629_s12 = smov 0   ;;  %s631_s13 = smov 0  }
   0x3   :  { %s633_s14 = smov 0   ;;  %s635_s15 = smov 0  }
   0x4   :  { %s637_s16 = smov 0   ;;  %s639_s17 = smov 0  }
   0x5 LB: > { %s402_s18 = sadd.s32 4294967295, %s602_s17   ;;  %s60_s19 = sadd.s32 1, %s590_s14  ;;  %s602_s17 = sphi %s639_s17, %s18_s17   ;;  %s598_s16 = sphi %s637_s16, %s768_s16   ;;  %s594_s15 = sphi %s635_s15, %s767_s15   ;;  %s590_s14 = sphi %s633_s14, %s766_s14   ;;  %s586_s13 = sphi %s631_s13, %s765_s13   ;;  %s582_s12 = sphi %s629_s12, %s764_s12  }
   0x6   : > { %p67_p0 = scmp.ne.s32.totalorder %s590_s14, %s586_s13  ;;  %p68_p1 = scmp.eq.s32.totalorder %s602_s17, 0 }
   0x7   : > { %p73_p2 = scmp.ne.s32.totalorder %s586_s13, %s582_s12  ;;  %p663_p3 = scmp.eq.s32.totalorder %s402_s18, 0 }
   0x8   : > { %p667_p4 = por %p68_p1, %p67_p0  ;;  %p404_p5 = scmp.ge.s32.totalorder %s602_s17, 1 }
   0x9   : > { %p674_p6 = por %p663_p3, %p73_p2  ;;  %p136_p7 = scmp.lt.s32.totalorder %s602_s17, 3 }
   0xa   : > { %s148_s25 = sshll.u32 %s755_s0, 4  ;;  %s604_s27 = smov [#allocation2]   ;;  %s149_s25 = int_to_ptr.hbm [resolvable:$true] %s148_s25 }
   0xb   : > { %p682_p8 = pnand %p404_p5, %p136_p7  ;;  %s150_s28 = sshll.u32 %s604_s27, 4  ;;  %s151_s28 = int_to_ptr.vmem [resolvable:$true] %s150_s28 }
   0xc   : > { %p433_p10 = scmp.lt.s32.totalorder %s602_s17, 2  ;;  %s30_s30 = sadd.s32 1, %s598_s16 }
   0xd   : > { %p424_p9 = pneg %p682_p8  ;;  %p32_p13 = scmp.ge.s32.totalorder %s30_s30, 2 }
   0xe   : > { %p693_p12 = pnand %p433_p10, %p667_p4  ;;  %s161_s4 = sand.u32 1, %s590_s14  }
   0xf   : > { %p425_p11 = pnand %p424_p9, %p663_p3  ;;  %s407_s5 = sshll.u32 %s598_s16, 3 }
  0x10   : > { %s770_s30 = smov (%p32_p13, %s30_s30), 0  ;;  %s416_s6 = smul.u32 40, %s161_s4 }
  0x11   : > { %427 = dma.hbm_to_vmem [thread:$0]  (!%p425_p11), %s149_s25, 128, %s151_s28, [#allocation3]  }
  0x12   : > { %s57_s7 = ssub.s32 %s598_s16, %s770_s30  ;;  %s170_s10 = scalar_lea.hbm %s756_s1, %s407_s5 }
  0x13   : > { %p58_p0 = scmp.eq.s32.totalorder %s57_s7, 0  ;;  %s171_s11 = sshll.u32 %s170_s10, 4  ;;  %s172_s11 = int_to_ptr.hbm [resolvable:$true] %s171_s11 }
  0x14   : > { %s165_s12 = scalar_lea.vmem [#allocation4], %s416_s6  ;;  %s162_s23 = scalar_lea.sflag [#allocation5], %s161_s4 }
  0x15   : > { %s173_s18 = sshll.u32 %s165_s12, 4  ;;  %s605_s24 = smov 256   ;;  %s174_s18 = int_to_ptr.vmem [resolvable:$true] %s173_s18 }
  0x16   : > { %s710_s21 = scalar_select %p58_p0, %s590_s14, %s60_s19  }
  0x17   : > { %s606_s25 = smov 128   ;;  %s607_s27 = smov 8  }
  0x18   : > { %431 = dma.hbm_to_vmem [thread:$0]  (!%p693_p12), %s172_s11, 640, %s174_s18, %s162_s23, %s605_s24, %s606_s25, %s607_s27  }
  0x19   : > { %185 = sbr.rel (%p682_p8) target bundleno = 299 (0x12b), region = 28 }
  0x1e   : > { %573 = dma.done.wait (%p663_p3), [#allocation3], 128  }
  0x1f   : > { %575 = vsyncadd (%p663_p3), [#allocation3], 4294967168  ;;  %s192_s19 = sand.u32 1, %s586_s13  }
  0x20   : > { %s417_s28 = smul.u32 40, %s192_s19  ;;  %s193_s5 = scalar_lea.sflag [#allocation5], %s192_s19 }
  0x22   : > { %s196_s4 = scalar_lea.vmem [#allocation4], %s417_s28 }
  0x23   : > { %577 = dma.done.wait (%p674_p6), %s193_s5, 640  }
  0x24   : > { %579 = vsyncadd (%p674_p6), %s193_s5, 4294966656  ;;  %vm242_vm0 = vcmask 1043456   ;;  %v237_v0 = vld [vmem:[%s196_s4 + $0x20] sm:$0xf]  ;;  %v236_v1 = vld [vmem:[%s196_s4 + $0x18] sm:$0xff]  ;;  %vm238_vm1 = vcmask 293888  }
  0x25   : > { %412 = vmatpush.msk.msra.mxu0 %vm242_vm0, %v237_v0  ;;  %v235_v2 = vld [vmem:[%s196_s4 + $0x10] sm:$0xff]  ;;  %v234_v3 = vld [vmem:[%s196_s4 + $0x8] sm:$0xff]  ;;  %v233_v4 = vld [vmem:[%s196_s4] sm:$0xff]  ;;  %p224_p1 = scmp.lt.s32.totalorder %s594_s15, 1  ;;  %vm270_vm2 = vcmask 7168   ;;  %v608_v6 = vmov 0.0  }
  0x26   : > { %v232_v5 = vld [vmem:[#allocation2] sm:$0xff] }
  0x27   : > { %258 = vmatpush.msra.mxu0 %v236_v1  ;;  %s772_s15 = smov (!%p224_p1, %s594_s15), 1 }
  0x28   : > { %s410_s20 = sshll.u32 %s772_s15, 3 }
  0x29   : > { %259 = vmatpush.msra.mxu0 %v235_v2  ;;  %s227_s29 = scalar_lea.vmem %s757_s2, %s410_s20  ;;  %s231_s8 = scalar_lea.vmem %s758_s3, %s410_s20 }
  0x2a   : > { %271 = vst.msk [vmem:[%s227_s29] sm:$0xff] %vm270_vm2, %v608_v6 }
  0x2b   : > { %260 = vmatpush.msra.mxu0 %v234_v3  ;;  %272 = vst.msk [vmem:[%s231_s8] sm:$0xff] %vm270_vm2, %v608_v6 }
  0x2d   : > { %261 = vmatpush.msra.mxu0 %v233_v4 }
  0x2e   : > { %413 = vmatmul.msk.f32.vlgmr.msra.gmra.mxu0 %vm238_vm1, %v232_v5 }
  0x31   : > { %v273_v9 = vld [vmem:[%s227_s29] sm:$0xff] }
  0x32   : > { %v279_v12 = vld [vmem:[%s231_s8] sm:$0xff] }
  0xab   : > { %v263_v7 = vpop.f32.mrf.mxu0 }
  0xac   : > { %274 = vadd.xlane.f32.xlu0 %v263_v7  ;;  %v280_v8 = vmul.f32 %v263_v7, %v263_v7 }
  0xb4   : > { %281 = vadd.xlane.f32.xlu0 %v280_v8 }
 0x11f   : > { %v275_v10 = vpop.xlane.xlu0 %274 }
 0x120   : > { %v276_v11 = vadd.f32 %v275_v10, %v273_v9 }
 0x122   : > { %278 = vst.msk [vmem:[%s227_s29] sm:$0xff] %vm270_vm2, %v276_v11 }
 0x127   : > { %v282_v13 = vpop.xlane.xlu0 %281 }
 0x128   : > { %v283_v14 = vadd.f32 %v282_v13, %v279_v12 }
 0x12a   : > { %284 = vst.msk [vmem:[%s231_s8] sm:$0xff] %vm270_vm2, %v283_v14 }
 0x12b PF: > { %s18_s17 = sadd.s32 1, %s602_s17   ;;  %s764_s12 = smov %s586_s13 }
 0x12c   : > { %p15_p2 = scmp.ge.s32.totalorder %s18_s17, 4   ;;  %s765_s13 = smov %s590_s14 }
 0x12d   : > { %s766_s14 = smov %s710_s21  ;;  %s767_s15 = smov %s598_s16 }
 0x12e   : > { %s768_s16 = smov %s770_s30  ;;  %17 = sbr.rel (!%p15_p2) target bundleno = 5 (0x5), region = 89 }
 0x133   :  { %318 = vsyncpa [#allocation3], 1 }
 0x134   :  { %320 = vsyncpa [#allocation3 + $0x1], 1 }
 0x135   :  { %321 = vsyncpa [#allocation5], 1 }
 0x136   :  { %323 = vsyncpa [#allocation5 + $0x1], 1 }

</bundles_post_ra>
